<compile_context>
chip_gen: v7x
topology: tpu7x:2x2x1
jax: 0.10.0
libtpu: 0.0.40
codegen_flags: <defaults>
</compile_context>

<pallas_src>
import functools

import jax
import jax.numpy as jnp
from jax.experimental import pallas as pl
from jax.experimental.pallas import tpu as pltpu


def _round_up(x: int, m: int) -> int:
    return (x + m - 1) // m * m


def _space_transformer_kernel(x_ref, w_ref, b_ref, o_ref, acc_ref):
    # x_ref: (tm, tk)  w_ref: (tk, tn)  b_ref: (1, tn) f32  o_ref: (tm, tn)
    # acc_ref: (tm, tn) f32 scratch, resident across the K (reduction) grid axis.
    k = pl.program_id(2)

    @pl.when(k == 0)
    def _():
        # Fold the bias into the accumulator so the epilogue is clip + cast only.
        acc_ref[...] = jnp.broadcast_to(b_ref[...], acc_ref.shape)

    acc_ref[...] += jnp.dot(
        x_ref[...], w_ref[...], preferred_element_type=jnp.float32
    )

    @pl.when(k == pl.num_programs(2) - 1)
    def _():
        y = jnp.clip(acc_ref[...], -10.0, 10.0)  # Hardtanh(-10, 10)
        o_ref[...] = y.astype(o_ref.dtype)


@functools.partial(jax.jit, static_argnames=("tm", "tn", "tk", "compute_dtype"))
def _space_transformer_2d(x, w, b, *, tm=256, tn=256, tk=512, compute_dtype=None):
    """y = hardtanh(x @ w + b, -10, 10) for 2-D x; dropout is eval-mode identity.

    x: [M, K]   w: [K, N] (PyTorch Linear weight transposed)   b: [N]
    compute_dtype: optional (e.g. jnp.bfloat16) dtype for x/w; accumulation is f32.
    """
    M, K = x.shape
    K2, N = w.shape
    assert K == K2 and b.shape == (N,)
    out_dtype = x.dtype

    if compute_dtype is not None:
        x = x.astype(compute_dtype)
        w = w.astype(compute_dtype)

    # Clamp tile sizes to the layout-aligned problem size: lane dims stay
    # multiples of 128, sublane dims multiples of 8.
    tm = min(tm, _round_up(M, 8))
    tn = min(tn, _round_up(N, 128))
    tk = min(tk, _round_up(K, 128))

    Mp, Kp, Np = _round_up(M, tm), _round_up(K, tk), _round_up(N, tn)

    # Zero-pad: padded K columns contribute 0 to the dot; padded rows/cols of the
    # output are sliced away at the end.
    if (Mp, Kp) != (M, K):
        x = jnp.pad(x, ((0, Mp - M), (0, Kp - K)))
    if (Kp, Np) != (K, N):
        w = jnp.pad(w, ((0, Kp - K), (0, Np - N)))
    b2 = jnp.pad(b.astype(jnp.float32), (0, Np - N)).reshape(1, Np)

    grid = (Mp // tm, Np // tn, Kp // tk)

    bytes_accessed = (
        x.size * x.dtype.itemsize
        + w.size * w.dtype.itemsize
        + b2.size * b2.dtype.itemsize
        + Mp * Np * jnp.dtype(out_dtype).itemsize
    )

    y = pl.pallas_call(
        _space_transformer_kernel,
        out_shape=jax.ShapeDtypeStruct((Mp, Np), out_dtype),
        grid_spec=pltpu.PrefetchScalarGridSpec(
            num_scalar_prefetch=0,
            grid=grid,
            in_specs=[
                pl.BlockSpec((tm, tk), lambda i, j, k: (i, k)),  # x row/k tile
                pl.BlockSpec((tk, tn), lambda i, j, k: (k, j)),  # w k/col tile
                pl.BlockSpec((1, tn), lambda i, j, k: (0, j)),   # bias col tile
            ],
            out_specs=pl.BlockSpec((tm, tn), lambda i, j, k: (i, j)),
            scratch_shapes=[pltpu.VMEM((tm, tn), jnp.float32)],
        ),
        compiler_params=pltpu.CompilerParams(
            dimension_semantics=("parallel", "parallel", "arbitrary"),
            vmem_limit_bytes=32 * 1024 * 1024,
        ),
        cost_estimate=pl.CostEstimate(
            flops=2 * Mp * Kp * Np,
            transcendentals=0,
            bytes_accessed=int(bytes_accessed),
        ),
    )(x, w, b2)

    return y[:M, :N]


def space_transformer(x, w, b, **kwargs):
    """Applies the SpaceTransformer forward to x of shape [..., K]."""
    K = x.shape[-1]
    lead = x.shape[:-1]
    x2 = x.reshape(-1, K)
    y2 = _space_transformer_2d(x2, w, b, **kwargs)
    return y2.reshape(*lead, w.shape[1])


def reference(x, w, b):
    y = x.astype(jnp.float32) @ w.astype(jnp.float32) + b[None, :]
    return jnp.clip(y, -10.0, 10.0)


if __name__ == "__main__":
    # Small shapes consistent with the module: input_size=32, output_size=64, batch=16.
    # (At this size a hand-written kernel is pure overhead vs. XLA fusing
    # clip(x@w+b); the kernel is written for — and only pays off at — real layer sizes.)
    input_size, output_size, batch = 32, 64, 16

    key = jax.random.PRNGKey(0)
    kx, kw, kb = jax.random.split(key, 3)

    x = jax.random.normal(kx, (batch, input_size), dtype=jnp.float32)
    bound = 1.0 / jnp.sqrt(input_size)
    # PyTorch Linear stores [out, in]; we keep the transposed [in, out] layout.
    w = jax.random.uniform(kw, (input_size, output_size), jnp.float32, -bound, bound)
    b = jax.random.uniform(kb, (output_size,), jnp.float32, -bound, bound)

    y_ref = reference(x, w, b)

    # f32 path (tight tolerance).
    y = jax.block_until_ready(space_transformer(x, w, b))
    assert y.shape == (batch, output_size)
    assert jnp.allclose(y, y_ref, atol=1e-5, rtol=1e-5)

    # Ragged batch (not a multiple of the row tile) — handled by pad + slice.
    y_rag = jax.block_until_ready(space_transformer(x[:13], w, b))
    assert y_rag.shape == (13, output_size)
    assert jnp.allclose(y_rag, y_ref[:13], atol=1e-5, rtol=1e-5)

    # Leading-dims input, like nn.Linear applied to [B, T, K].
    x3 = x.reshape(2, 8, input_size)
    y3 = jax.block_until_ready(space_transformer(x3, w, b))
    assert y3.shape == (2, 8, output_size)
    assert jnp.allclose(y3.reshape(batch, output_size), y_ref, atol=1e-5, rtol=1e-5)

    # bf16 inputs/weights with f32 accumulation (looser tolerance).
    y_bf16 = jax.block_until_ready(
        space_transformer(x, w, b, compute_dtype=jnp.bfloat16)
    )
    assert jnp.allclose(y_bf16, y_ref, atol=5e-2, rtol=5e-2)

    print("KERNEL_OK")
</pallas_src>

<mosaic_0001>
module attributes {stable_mosaic.version = 11 : i64} {
  func.func @_space_transformer_kernel(%arg0: i32, %arg1: i32, %arg2: i32, %arg3: memref<16x128xf32, #tpu.memory_space<vmem>>, %arg4: memref<128x128xf32, #tpu.memory_space<vmem>>, %arg5: memref<1x128xf32, #tpu.memory_space<vmem>>, %arg6: memref<16x128xf32, #tpu.memory_space<vmem>>, %arg7: memref<16x128xf32, #tpu.memory_space<vmem>>) attributes {dimension_semantics = [#tpu.dimension_semantics<parallel>, #tpu.dimension_semantics<parallel>, #tpu.dimension_semantics<arbitrary>], iteration_bounds = array<i64: 1, 1, 1>, scalar_prefetch = 0 : i64, scratch_operands = 1 : i64, tpu.core_type = #tpu.core_type<tc>, window_params = [{transform_indices = @transform_0, window_bounds = array<i64: 16, 128>}, {transform_indices = @transform_1, window_bounds = array<i64: 128, 128>}, {transform_indices = @transform_2, window_bounds = array<i64: 1, 128>}, {transform_indices = @transform_3, window_bounds = array<i64: 16, 128>}]} {
    %c0_i32 = arith.constant 0 : i32
    %0 = arith.cmpi eq, %arg2, %c0_i32 : i32
    %1 = arith.extui %0 : i1 to i32
    %c0_i32_0 = arith.constant 0 : i32
    %2 = arith.cmpi ne, %1, %c0_i32_0 : i32
    scf.if %2 {
      %c0_10 = arith.constant 0 : index
      %c0_11 = arith.constant 0 : index
      %12 = vector.load %arg5[%c0_10, %c0_11] : memref<1x128xf32, #tpu.memory_space<vmem>>, vector<1x128xf32>
      %13 = vector.shape_cast %12 : vector<1x128xf32> to vector<1x128xf32>
      %14 = vector.broadcast %13 : vector<1x128xf32> to vector<16x128xf32>
      %c0_12 = arith.constant 0 : index
      %c0_13 = arith.constant 0 : index
      %15 = vector.load %arg7[%c0_12, %c0_13] : memref<16x128xf32, #tpu.memory_space<vmem>>, vector<16x128xf32>
      tpu.vector_store %arg7[%c0_12, %c0_13], %14 {strides = array<i32>} : memref<16x128xf32, #tpu.memory_space<vmem>>, vector<16x128xf32>,
    } else {
    }
    %c0 = arith.constant 0 : index
    %c0_1 = arith.constant 0 : index
    %3 = vector.load %arg7[%c0, %c0_1] : memref<16x128xf32, #tpu.memory_space<vmem>>, vector<16x128xf32>
    %c0_2 = arith.constant 0 : index
    %c0_3 = arith.constant 0 : index
    %4 = vector.load %arg3[%c0_2, %c0_3] : memref<16x128xf32, #tpu.memory_space<vmem>>, vector<16x128xf32>
    %c0_4 = arith.constant 0 : index
    %c0_5 = arith.constant 0 : index
    %5 = vector.load %arg4[%c0_4, %c0_5] : memref<128x128xf32, #tpu.memory_space<vmem>>, vector<128x128xf32>
    %cst = arith.constant dense<0.000000e+00> : vector<16x128xf32>
    %6 = tpu.matmul %4, %5, %cst {dimension_numbers = #tpu.dot_dimension_numbers<[1], [0], [0], [1], [0, 0, 1, 1], [], []>} : vector<16x128xf32>, vector<128x128xf32>, vector<16x128xf32> -> vector<16x128xf32>
    %7 = arith.addf %3, %6 : vector<16x128xf32>
    %c0_6 = arith.constant 0 : index
    %c0_7 = arith.constant 0 : index
    %8 = vector.load %arg7[%c0_6, %c0_7] : memref<16x128xf32, #tpu.memory_space<vmem>>, vector<16x128xf32>
    tpu.vector_store %arg7[%c0_6, %c0_7], %7 {strides = array<i32>} : memref<16x128xf32, #tpu.memory_space<vmem>>, vector<16x128xf32>,
    %c0_i32_8 = arith.constant 0 : i32
    %9 = arith.cmpi eq, %arg2, %c0_i32_8 : i32
    %10 = arith.extui %9 : i1 to i32
    %c0_i32_9 = arith.constant 0 : i32
    %11 = arith.cmpi ne, %10, %c0_i32_9 : i32
    scf.if %11 {
      %c0_10 = arith.constant 0 : index
      %c0_11 = arith.constant 0 : index
      %12 = vector.load %arg7[%c0_10, %c0_11] : memref<16x128xf32, #tpu.memory_space<vmem>>, vector<16x128xf32>
      %cst_12 = arith.constant -1.000000e+01 : f32
      %cst_13 = arith.constant 1.000000e+01 : f32
      %13 = vector.broadcast %cst_12 : f32 to vector<16x128xf32>
      %14 = arith.maximumf %13, %12 : vector<16x128xf32>
      %15 = vector.broadcast %cst_13 : f32 to vector<16x128xf32>
      %16 = arith.minimumf %15, %14 : vector<16x128xf32>
      %c0_14 = arith.constant 0 : index
      %c0_15 = arith.constant 0 : index
      %17 = vector.load %arg6[%c0_14, %c0_15] : memref<16x128xf32, #tpu.memory_space<vmem>>, vector<16x128xf32>
      tpu.vector_store %arg6[%c0_14, %c0_15], %16 {strides = array<i32>} : memref<16x128xf32, #tpu.memory_space<vmem>>, vector<16x128xf32>,
    } else {
    }
    return
  }
  func.func @transform_0(%arg0: i32, %arg1: i32, %arg2: i32) -> (i32, i32) {
    %c0_i32 = arith.constant 0 : i32
    return %arg0, %arg2 : i32, i32
  }
  func.func @transform_1(%arg0: i32, %arg1: i32, %arg2: i32) -> (i32, i32) {
    %c0_i32 = arith.constant 0 : i32
    return %arg2, %arg1 : i32, i32
  }
  func.func @transform_2(%arg0: i32, %arg1: i32, %arg2: i32) -> (i32, i32) {
    %c0_i32 = arith.constant 0 : i32
    %c0_i32_0 = arith.constant 0 : i32
    return %c0_i32, %arg1 : i32, i32
  }
  func.func @transform_3(%arg0: i32, %arg1: i32, %arg2: i32) -> (i32, i32) {
    %c0_i32 = arith.constant 0 : i32
    return %arg0, %arg1 : i32, i32
  }
}

</mosaic_0001>

<bundles_post_ra>
// kernel: _space_transformer_2d.1
= control target key start
LH: loop header
LB: loop body
LE: loop exit
PB: predicated region body
PF: predicated region fallthrough
CT: control target
= control target key end

     0   :  { %s361_s0 = inlined_call_operand.vmem [shape: f32[16,128], index: 0, kind: input, shape index: {}]   ;;  %s362_s1 = inlined_call_operand.vmem [shape: f32[128,128], index: 1, kind: input, shape index: {}]   ;;  %s363_s2 = inlined_call_operand.vmem [shape: f32[1,128], index: 2, kind: input, shape index: {}]   ;;  %s364_s3 = inlined_call_operand.hbm [shape: f32[16,128], index: 3, kind: output, shape index: {}]  }
   0x1   :  { %v32_v0 = vld [vmem:[%s362_s1] sm:$0xff]  ;;  %v33_v1 = vld [vmem:[%s362_s1 + $0x8] sm:$0xff]  ;;  %v34_v2 = vld [vmem:[%s362_s1 + $0x10] sm:$0xff] }
   0x2   :  { %v210_v3 = vpack.c.bf16 %v33_v1, %v32_v0  ;;  %v35_v4 = vld [vmem:[%s362_s1 + $0x18] sm:$0xff]  ;;  %v36_v6 = vld [vmem:[%s362_s1 + $0x20] sm:$0xff]  ;;  %v37_v7 = vld [vmem:[%s362_s1 + $0x28] sm:$0xff] }
   0x3   :  { %v214_v5 = vpack.c.bf16 %v35_v4, %v34_v2  ;;  %v218_v8 = vpack.c.bf16 %v37_v7, %v36_v6  ;;  %v30_v9 = vld [vmem:[%s361_s0] sm:$0xff]  ;;  %v38_v10 = vld [vmem:[%s362_s1 + $0x30] sm:$0xff]  ;;  %v39_v11 = vld [vmem:[%s362_s1 + $0x38] sm:$0xff] }
   0x4   :  { %211 = vmatprep.subr.bf16.mxu0 %v210_v3  ;;  %207 = vmatprep.mubr.f32.mxu0 %v30_v9 }
   0x5   :  { %213 = vmatpush3.bf16.msra.mxu0 %v210_v3 }
   0x6   :  { %215 = vmatprep.subr.bf16.mxu0 %v214_v5 }
   0x7   :  { %8 = vsyncpa [#allocation4], 0  ;;  %v222_v12 = vpack.c.bf16 %v39_v11, %v38_v10  ;;  %v40_v13 = vld [vmem:[%s362_s1 + $0x40] sm:$0xff]  ;;  %v41_v14 = vld [vmem:[%s362_s1 + $0x48] sm:$0xff]  ;;  %s269_s23 = smov [#allocation3]  }
   0x8   :  { %v226_v15 = vpack.c.bf16 %v41_v14, %v40_v13  ;;  %v42_v16 = vld [vmem:[%s362_s1 + $0x50] sm:$0xff]  ;;  %v43_v17 = vld [vmem:[%s362_s1 + $0x58] sm:$0xff]  ;;  %v44_v19 = vld [vmem:[%s362_s1 + $0x60] sm:$0xff]  ;;  %s143_s24 = sshll.u32 %s269_s23, 4  ;;  %s144_s24 = int_to_ptr.vmem [resolvable:$true] %s143_s24 }
   0x9   :  { %217 = vmatpush3.bf16.msra.mxu0 %v214_v5  ;;  %v230_v18 = vpack.c.bf16 %v43_v17, %v42_v16  ;;  %v45_v20 = vld [vmem:[%s362_s1 + $0x68] sm:$0xff]  ;;  %v46_v22 = vld [vmem:[%s362_s1 + $0x70] sm:$0xff]  ;;  %v47_v23 = vld [vmem:[%s362_s1 + $0x78] sm:$0xff]  ;;  %s245_s1 = scalar_lea.vmem %s144_s24, 256  ;;  %p250_p1 = scmp.lt.s32.totalorder %s144_s24, %s144_s24 }
   0xa   :  { %219 = vmatprep.subr.bf16.mxu0 %v218_v8  ;;  %v234_v21 = vpack.c.bf16 %v45_v20, %v44_v19  ;;  %v238_v24 = vpack.c.bf16 %v47_v23, %v46_v22  ;;  %v31_v25 = vld [vmem:[%s361_s0 + $0x8] sm:$0xff]  ;;  %v154_v26 = vld [vmem:[%s363_s2] ss:$0 sm:$0xff]  ;;  %p246_p0 = scmp.ne.s32.totalorder %s144_s24, %s245_s1  ;;  %p251_p2 = scmp.lt.s32.totalorder %s245_s1, %s245_s1 }
   0xc   :  { %p252_p3 = por %p251_p2, %p250_p1 }
   0xd   :  { %221 = vmatpush3.bf16.msra.mxu0 %v218_v8 }
   0xe   :  { %223 = vmatprep.subr.bf16.mxu0 %v222_v12  ;;  %p253_p4 = pnand %p252_p3, %p246_p0 }
  0x11   :  { %225 = vmatpush3.bf16.msra.mxu0 %v222_v12 }
  0x12   :  { %227 = vmatprep.subr.bf16.mxu0 %v226_v15 }
  0x15   :  { %229 = vmatpush3.bf16.msra.mxu0 %v226_v15 }
  0x16   :  { %231 = vmatprep.subr.bf16.mxu0 %v230_v18 }
  0x19   :  { %233 = vmatpush3.bf16.msra.mxu0 %v230_v18 }
  0x1a   :  { %235 = vmatprep.subr.bf16.mxu0 %v234_v21 }
  0x1d   :  { %237 = vmatpush3.bf16.msra.mxu0 %v234_v21 }
  0x1e   :  { %239 = vmatprep.subr.bf16.mxu0 %v238_v24 }
  0x21   :  { %241 = vmatpush3.bf16.msra.mxu0 %v238_v24 }
  0x24   :  { %208 = vmatmul.mubr.f32.vlgmr.msra.gmra.mrb[0].mxu0 %v31_v25 }
  0xf7   :  { %v209_v27 = vpop.f32.mrb[0].mxu0 }
  0xf8   :  { %v124_v28 = vadd.f32 %v209_v27, %v154_v26  ;;  %v114_v29 = vpop.f32.mrb[1].mxu0 }
  0xf9   :  { %v123_v30 = vadd.f32 %v154_v26, %v114_v29 }
  0xfa   :  { %v156_v31 = vclamps-f32 %v124_v28, 10.0 }
  0xfb   :  { %v155_v32 = vclamps-f32 %v123_v30, 10.0 }
  0xfc   :  { %137 = vst [vmem:[#allocation3 + $0x8] sm:$0xff] %v156_v31 }
  0xfd   :  { %136 = vst [vmem:[#allocation3] sm:$0xff] %v155_v32 }
  0xfe   :  { %256 = shalt.err (!%p253_p4)
}
  0xff   :  { %s257_s25 = scalar_lea.hbm %s364_s3, 256 }
 0x100   :  { %p258_p5 = scmp.ne.s32.totalorder %s364_s3, %s257_s25  ;;  %p261_p6 = scmp.lt.u32.totalorder %s257_s25, %s364_s3 }
 0x102   :  { %p263_p7 = pnand %p261_p6, %p258_p5 }
 0x104   :  { %266 = shalt.err (!%p263_p7)
}
 0x105   :  { %s270_s30 = smov 128   ;;  %s271_s4 = smov 8  }
 0x106   :  { %149 = dma.vmem_to_hbm [thread:$0]  %s144_s24, 256, %s364_s3, [#allocation4], %s270_s30, %s270_s30, %s271_s4  }
 0x107   :  { %267 = dma.done.wait [#allocation4], 256  }
 0x108   :  { %268 = vsyncadd [#allocation4], 4294967040 }
 0x109   :  { %153 = vsyncpa [#allocation4], 1 }

</bundles_post_ra>
